<compile_context>
chip_gen: v7x
topology: tpu7x:2x2x1
jax: 0.10.0
libtpu: 0.0.40
codegen_flags: <defaults>
</compile_context>

<pallas_src>
import jax
import jax.numpy as jnp
from jax.experimental import pallas as pl
from jax.experimental.pallas import tpu as pltpu

LANE = 128
MIN_TILE_B = 8 * LANE  # 1024 rows: keeps the (rows, 128) output block 8-sublane aligned


def _round_up(n: int, m: int) -> int:
    return ((n + m - 1) // m) * m


def node_kernel(x_ref, w_ref, b_ref, out_ref, acc_ref):
    # x_ref  : (rows, 128, tile_k)  stream dtype, VMEM (streamed batch tile)
    # w_ref  : (1, 1, tile_k)       stream dtype, VMEM (same block every batch step)
    # b_ref  : (1, 1) float32       SMEM scalar bias
    # out_ref: (rows, 128) float32  lane-dense output block
    # acc_ref: (rows, 128) float32  VMEM accumulator (for the K split)
    k = pl.program_id(1)

    @pl.when(k == 0)
    def _():
        acc_ref[...] = jnp.zeros_like(acc_ref)

    # VPU multiply (bf16 VALU on v6e/v7x if streaming bf16) + f32 accumulate,
    # cross-lane (XLU) reduce straight into the lane-dense (rows, 128) layout.
    prod = x_ref[...] * w_ref[...]
    if prod.dtype != jnp.float32:
        prod = prod.astype(jnp.float32)
    acc_ref[...] += jnp.sum(prod, axis=-1)

    @pl.when(k == pl.num_programs(1) - 1)
    def _():
        out_ref[...] = jax.nn.sigmoid(acc_ref[...] + b_ref[0, 0])


def node_forward(x, w, b, *, vmem_budget_bytes: int = 24 << 20, stream_dtype=None):
    """go_right_prob = sigmoid(x @ w + b).

    x: (B, D); w: fc weight, any of (D, 1) / (D,) / (1, D); b: scalar bias.
    Returns (B, 1) float32.
    """
    B, D = x.shape
    dtype = jnp.dtype(x.dtype if stream_dtype is None else stream_dtype)
    itemsize = dtype.itemsize

    # No wrapper-side cast unless the caller explicitly requests a narrower
    # stream dtype (a separate f32->bf16 XLA pass costs more HBM than it saves).
    if x.dtype != dtype:
        x = x.astype(dtype)
    w_row = jnp.asarray(w, dtype=dtype).reshape(1, 1, D)
    b_s = jnp.asarray(b, dtype=jnp.float32).reshape(1, 1)

    # ---- batch tiling, driven by a VMEM byte budget ------------------------
    b128 = _round_up(B, LANE)
    d_pad = _round_up(D, LANE)                 # lane padding of a VMEM row (D<128 pads to 128)
    per_row_bytes = 2 * (d_pad * itemsize + 4)  # dbl-buffered x row + dbl-buffered out elem
    tb_fit = vmem_budget_bytes // per_row_bytes

    if b128 <= MIN_TILE_B:
        tile_b = b128                          # tiny batch: a single (<=1024-row) tile
    else:
        tile_b = max((min(tb_fit, b128) // MIN_TILE_B) * MIN_TILE_B, MIN_TILE_B)
        # v7x has 2 TensorCores: keep >= 2 grid steps so the "parallel" axis splits.
        tile_b = min(tile_b, _round_up(pl.cdiv(b128, 2), MIN_TILE_B))
    n_tiles = pl.cdiv(b128, tile_b)
    rows = tile_b // LANE

    # ---- feature (K) split, only if a full-D tile over-runs the budget -----
    if 2 * (tile_b * d_pad * itemsize + tile_b * 4) <= vmem_budget_bytes:
        tile_k, n_k = D, 1
    else:
        avail = vmem_budget_bytes // 2 - tile_b * 4
        tile_k = max(((avail // (tile_b * itemsize)) // LANE) * LANE, LANE)
        tile_k = min(tile_k, d_pad)
        n_k = pl.cdiv(D, tile_k)
        if n_k == 1:
            tile_k = D
    d_full = n_k * tile_k if n_k > 1 else D

    # ---- padding: only when strictly required ------------------------------
    #  * batch rows -> multiple of 128 so the (B/128, 128, D) view is a free reshape
    #  * feature dim -> multiple of tile_k (zero-padded, so K partial sums stay exact)
    # For B % 128 == 0 and a full-D tile (the common large-batch case) no copy is made.
    pad_b, pad_d = b128 - B, d_full - D
    if pad_b or pad_d:
        x = jnp.pad(x, ((0, pad_b), (0, pad_d)))
    if pad_d:
        w_row = jnp.pad(w_row, ((0, 0), (0, 0), (0, pad_d)))
    x3 = x.reshape(b128 // LANE, LANE, d_full)      # free row-major reshape

    out = pl.pallas_call(
        node_kernel,
        out_shape=jax.ShapeDtypeStruct((n_tiles * rows, LANE), jnp.float32),
        grid=(n_tiles, n_k),
        in_specs=[
            pl.BlockSpec((rows, LANE, tile_k), lambda i, k: (i, 0, k)),   # x: streamed
            pl.BlockSpec((1, 1, tile_k), lambda i, k: (0, 0, k)),         # w: resident row
            pl.BlockSpec(memory_space=pltpu.MemorySpace.SMEM),            # b: SMEM scalar
        ],
        out_specs=pl.BlockSpec((rows, LANE), lambda i, k: (i, 0)),        # lane-dense
        scratch_shapes=[pltpu.VMEM((rows, LANE), jnp.float32)],
        compiler_params=pltpu.CompilerParams(
            dimension_semantics=("parallel", "arbitrary"),
            # 32 MiB scoped VMEM is safe on v5e (128 MiB phys), v6e (default) and
            # v7x (64 MiB phys); the tile budget above keeps us well under it.
            vmem_limit_bytes=min(max(32 << 20, vmem_budget_bytes + (8 << 20)), 128 << 20),
        ),
        cost_estimate=pl.CostEstimate(
            flops=2 * B * D + B,
            transcendentals=B,
            bytes_accessed=B * D * itemsize + B * 4,
        ),
    )(x3, w_row, b_s)

    # (n_tiles*rows, 128) row-major == padded-batch order; crop back to (B, 1).
    # Padded / ragged tail rows hold sigmoid(garbage + b) and are dropped here.
    return out.reshape(n_tiles * tile_b, 1)[:B]


if __name__ == "__main__":
    key = jax.random.PRNGKey(0)
    kx, kw, kb, kx2, kw2, kb2 = jax.random.split(key, 6)

    # --- small shapes consistent with the module: fc = Linear(hidden=32, 1) ---
    batch, hidden = 8, 32
    x = jax.random.normal(kx, (batch, hidden), dtype=jnp.float32)
    w = jax.random.normal(kw, (hidden, 1), dtype=jnp.float32) * 0.1
    b = jax.random.normal(kb, (1, 1), dtype=jnp.float32) * 0.1

    out = node_forward(x, w, b)
    jax.block_until_ready(out)
    ref = jax.nn.sigmoid(jnp.sum(x * w.reshape(1, -1), axis=-1, keepdims=True) + b)
    assert out.shape == (batch, 1)
    assert jnp.allclose(out, ref, atol=1e-5, rtol=1e-5), float(jnp.max(jnp.abs(out - ref)))

    # --- larger, non-aligned shape that exercises multi-tile batch + K split
    #     (tiny budget forces tile_b=1024, 3 batch tiles w/ ragged tail, 3 k steps)
    B2, D2 = 2500, 384
    x2 = jax.random.normal(kx2, (B2, D2), dtype=jnp.float32)
    w2 = jax.random.normal(kw2, (D2, 1), dtype=jnp.float32) * 0.05
    b2 = jax.random.normal(kb2, (1, 1), dtype=jnp.float32) * 0.1
    out2 = node_forward(x2, w2, b2, vmem_budget_bytes=2 << 20)
    jax.block_until_ready(out2)
    ref2 = jax.nn.sigmoid(jnp.sum(x2 * w2.reshape(1, -1), axis=-1, keepdims=True) + b2)
    assert out2.shape == (B2, 1)
    assert jnp.allclose(out2, ref2, atol=1e-5, rtol=1e-5), float(jnp.max(jnp.abs(out2 - ref2)))

    print("KERNEL_OK")
</pallas_src>

<mosaic_0001>
module attributes {stable_mosaic.version = 11 : i64} {
  func.func @node_kernel(%arg0: i32, %arg1: i32, %arg2: memref<1x128x32xf32, #tpu.memory_space<vmem>>, %arg3: memref<1x1x32xf32, #tpu.memory_space<vmem>>, %arg4: memref<1x1xf32, #tpu.memory_space<smem>>, %arg5: memref<1x128xf32, #tpu.memory_space<vmem>>, %arg6: memref<1x128xf32, #tpu.memory_space<vmem>>) attributes {dimension_semantics = [#tpu.dimension_semantics<parallel>, #tpu.dimension_semantics<arbitrary>], iteration_bounds = array<i64: 1, 1>, scalar_prefetch = 0 : i64, scratch_operands = 1 : i64, tpu.core_type = #tpu.core_type<tc>, window_params = [{transform_indices = @transform_0, window_bounds = array<i64: 1, 128, 32>}, {transform_indices = @transform_1, window_bounds = array<i64: 1, 1, 32>}, {transform_indices = @transform_2, window_bounds = array<i64: 1, 1>}, {transform_indices = @transform_3, window_bounds = array<i64: 1, 128>}]} {
    %c0_i32 = arith.constant 0 : i32
    %0 = arith.cmpi eq, %arg1, %c0_i32 : i32
    %1 = arith.extui %0 : i1 to i32
    %c0_i32_0 = arith.constant 0 : i32
    %2 = arith.cmpi ne, %1, %c0_i32_0 : i32
    scf.if %2 {
      %cst_12 = arith.constant 0.000000e+00 : f32
      %14 = vector.broadcast %cst_12 : f32 to vector<1x128xf32>
      %c0_13 = arith.constant 0 : index
      %c0_14 = arith.constant 0 : index
      %15 = vector.load %arg6[%c0_13, %c0_14] : memref<1x128xf32, #tpu.memory_space<vmem>>, vector<1x128xf32>
      tpu.vector_store %arg6[%c0_13, %c0_14], %14 {strides = array<i32>} : memref<1x128xf32, #tpu.memory_space<vmem>>, vector<1x128xf32>,
    } else {
    }
    %c0 = arith.constant 0 : index
    %c0_1 = arith.constant 0 : index
    %c0_2 = arith.constant 0 : index
    %3 = vector.load %arg2[%c0, %c0_1, %c0_2] : memref<1x128x32xf32, #tpu.memory_space<vmem>>, vector<1x128x32xf32>
    %c0_3 = arith.constant 0 : index
    %c0_4 = arith.constant 0 : index
    %c0_5 = arith.constant 0 : index
    %4 = vector.load %arg3[%c0_3, %c0_4, %c0_5] : memref<1x1x32xf32, #tpu.memory_space<vmem>>, vector<1x1x32xf32>
    %5 = vector.broadcast %4 : vector<1x1x32xf32> to vector<1x128x32xf32>
    %6 = arith.mulf %3, %5 : vector<1x128x32xf32>
    %c0_6 = arith.constant 0 : index
    %c0_7 = arith.constant 0 : index
    %7 = vector.load %arg6[%c0_6, %c0_7] : memref<1x128xf32, #tpu.memory_space<vmem>>, vector<1x128xf32>
    %cst = arith.constant dense<0.000000e+00> : vector<1x128xf32>
    %8 = vector.multi_reduction <add>, %6, %cst [2] : vector<1x128x32xf32> to vector<1x128xf32>
    %9 = arith.addf %7, %8 : vector<1x128xf32>
    %c0_8 = arith.constant 0 : index
    %c0_9 = arith.constant 0 : index
    %10 = vector.load %arg6[%c0_8, %c0_9] : memref<1x128xf32, #tpu.memory_space<vmem>>, vector<1x128xf32>
    tpu.vector_store %arg6[%c0_8, %c0_9], %9 {strides = array<i32>} : memref<1x128xf32, #tpu.memory_space<vmem>>, vector<1x128xf32>,
    %c0_i32_10 = arith.constant 0 : i32
    %11 = arith.cmpi eq, %arg1, %c0_i32_10 : i32
    %12 = arith.extui %11 : i1 to i32
    %c0_i32_11 = arith.constant 0 : i32
    %13 = arith.cmpi ne, %12, %c0_i32_11 : i32
    scf.if %13 {
      %c0_12 = arith.constant 0 : index
      %c0_13 = arith.constant 0 : index
      %14 = vector.load %arg6[%c0_12, %c0_13] : memref<1x128xf32, #tpu.memory_space<vmem>>, vector<1x128xf32>
      %c0_14 = arith.constant 0 : index
      %c0_15 = arith.constant 0 : index
      %15 = memref.load %arg4[%c0_14, %c0_15] : memref<1x1xf32, #tpu.memory_space<smem>>
      %16 = vector.broadcast %15 : f32 to vector<1x128xf32>
      %17 = arith.addf %14, %16 : vector<1x128xf32>
      %18 = arith.negf %17 : vector<1x128xf32>
      %19 = math.exp %18 : vector<1x128xf32>
      %cst_16 = arith.constant 1.000000e+00 : f32
      %20 = vector.broadcast %cst_16 : f32 to vector<1x128xf32>
      %21 = arith.addf %20, %19 : vector<1x128xf32>
      %22 = arith.divf %20, %21 : vector<1x128xf32>
      %c0_17 = arith.constant 0 : index
      %c0_18 = arith.constant 0 : index
      %23 = vector.load %arg5[%c0_17, %c0_18] : memref<1x128xf32, #tpu.memory_space<vmem>>, vector<1x128xf32>
      tpu.vector_store %arg5[%c0_17, %c0_18], %22 {strides = array<i32>} : memref<1x128xf32, #tpu.memory_space<vmem>>, vector<1x128xf32>,
    } else {
    }
    return
  }
  func.func @transform_0(%arg0: i32, %arg1: i32) -> (i32, i32, i32) {
    %c0_i32 = arith.constant 0 : i32
    %c0_i32_0 = arith.constant 0 : i32
    return %arg0, %c0_i32, %arg1 : i32, i32, i32
  }
  func.func @transform_1(%arg0: i32, %arg1: i32) -> (i32, i32, i32) {
    %c0_i32 = arith.constant 0 : i32
    %c0_i32_0 = arith.constant 0 : i32
    %c0_i32_1 = arith.constant 0 : i32
    return %c0_i32, %c0_i32_0, %arg1 : i32, i32, i32
  }
  func.func @transform_2(%arg0: i32, %arg1: i32) -> (i32, i32) {
    %c0_i32 = arith.constant 0 : i32
    %c0_i32_0 = arith.constant 0 : i32
    %c0_i32_1 = arith.constant 0 : i32
    return %c0_i32, %c0_i32_0 : i32, i32
  }
  func.func @transform_3(%arg0: i32, %arg1: i32) -> (i32, i32) {
    %c0_i32 = arith.constant 0 : i32
    %c0_i32_0 = arith.constant 0 : i32
    return %arg0, %c0_i32 : i32, i32
  }
}

</mosaic_0001>

<bundles_post_ra>
// kernel: tpu_custom_call.1
= control target key start
LH: loop header
LB: loop body
LE: loop exit
PB: predicated region body
PF: predicated region fallthrough
CT: control target
= control target key end

     0   :  { %vm61_vm0 = vcmask 261120   ;;  %s2089_s0 = inlined_call_operand.vmem [shape: f32[1,128,32], index: 0, kind: input, shape index: {}]   ;;  %s2090_s1 = inlined_call_operand.vmem [shape: f32[1,1,32], index: 1, kind: input, shape index: {}]   ;;  %s2091_s2 = inlined_call_operand.<no memory space> [shape: f32[1,1], index: 2, kind: input, shape index: {}]   ;;  %s2092_s3 = inlined_call_operand.hbm [shape: f32[1,128], index: 3, kind: output, shape index: {}]  }
   0x1   :  { %v21_v0 = vld [vmem:[%s2089_s0] sm:$0xff]  ;;  %v23_v2 = vld [vmem:[%s2089_s0 + $0x10] sm:$0xff]  ;;  %v22_v5 = vld [vmem:[%s2089_s0 + $0x8] sm:$0xff] }
   0x2   :  { %v1626_v1 = vld [vmem:[%s2090_s1] ss:$0 sm:$0xff]  ;;  %v24_v6 = vld [vmem:[%s2089_s0 + $0x18] sm:$0xff]  ;;  %v26_v9 = vld [vmem:[%s2089_s0 + $0x28] sm:$0xff] }
   0x3   :  { %v44_v3 = vmul.f32 %v1626_v1, %v21_v0  ;;  %v46_v4 = vmul.f32 %v1626_v1, %v23_v2  ;;  %v45_v7 = vmul.f32 %v1626_v1, %v22_v5  ;;  %v47_v8 = vmul.f32 %v1626_v1, %v24_v6  ;;  %v25_v10 = vld [vmem:[%s2089_s0 + $0x20] sm:$0xff] }
   0x4   :  { %v49_v15 = vmul.f32 %v1626_v1, %v26_v9  ;;  %v48_v16 = vmul.f32 %v1626_v1, %v25_v10 }
   0x5   :  { %v62_v11 = vsel %vm61_vm0, %v44_v3, 0.0  ;;  %v68_v12 = vsel %vm61_vm0, %v46_v4, 0.0  ;;  %v65_v13 = vsel %vm61_vm0, %v45_v7, 0.0  ;;  %v71_v14 = vsel %vm61_vm0, %v47_v8, 0.0 }
   0x6   :  { %63 = vadd.xlane.f32.xlu0 %v62_v11  ;;  %69 = vadd.xlane.f32.xlu1 %v68_v12 }
   0x7   :  { %9 = vsyncpa [#allocation5], 0  ;;  %v28_v17 = vld [vmem:[%s2089_s0 + $0x38] sm:$0xff]  ;;  %v27_v18 = vld [vmem:[%s2089_s0 + $0x30] sm:$0xff]  ;;  %v77_v19 = vsel %vm61_vm0, %v49_v15, 0.0  ;;  %v74_v21 = vsel %vm61_vm0, %v48_v16, 0.0  ;;  %v126_v50 = vlaneseq }
   0x8   :  { %v51_v20 = vmul.f32 %v1626_v1, %v28_v17  ;;  %v50_v22 = vmul.f32 %v1626_v1, %v27_v18  ;;  %v30_v23 = vld [vmem:[%s2089_s0 + $0x48] sm:$0xff]  ;;  %v29_v24 = vld [vmem:[%s2089_s0 + $0x40] sm:$0xff]  ;;  %v32_v29 = vld [vmem:[%s2089_s0 + $0x58] sm:$0xff]  ;;  %v1662_v47 = vmov 0   ;;  %v1663_v51 = vmov 1966171168  }
   0x9   :  { %v53_v26 = vmul.f32 %v1626_v1, %v30_v23  ;;  %v52_v28 = vmul.f32 %v1626_v1, %v29_v24  ;;  %v31_v30 = vld [vmem:[%s2089_s0 + $0x50] sm:$0xff]  ;;  %v55_v32 = vmul.f32 %v1626_v1, %v32_v29  ;;  %v34_v35 = vld [vmem:[%s2089_s0 + $0x68] sm:$0xff]  ;;  %v33_v36 = vld [vmem:[%s2089_s0 + $0x60] sm:$0xff]  ;;  %1632 = vset.pattern.permute.xlu0 %v1662_v47  ;;  %1633 = vset.pattern.permute.xlu1 %v1662_v47  ;;  %v643_v52 = vunpack.c.l.s4 %v1663_v51  ;;  %s1665_s19 = smov [#allocation4]  }
   0xa   :  { %66 = vadd.xlane.f32.xlu0 %v65_v13  ;;  %72 = vadd.xlane.f32.xlu1 %v71_v14  ;;  %v83_v25 = vsel %vm61_vm0, %v51_v20, 0.0  ;;  %v80_v27 = vsel %vm61_vm0, %v50_v22, 0.0  ;;  %v54_v34 = vmul.f32 %v1626_v1, %v31_v30  ;;  %v57_v38 = vmul.f32 %v1626_v1, %v34_v35  ;;  %v36_v39 = vld [vmem:[%s2089_s0 + $0x78] sm:$0xff]  ;;  %v35_v42 = vld [vmem:[%s2089_s0 + $0x70] sm:$0xff]  ;;  %s1618_s20 = sshll.u32 %s1665_s19, 4  ;;  %s1619_s20 = int_to_ptr.vmem [resolvable:$true] %s1618_s20 }
   0xb   :  { %v89_v31 = vsel %vm61_vm0, %v53_v26, 0.0  ;;  %v86_v33 = vsel %vm61_vm0, %v52_v28, 0.0  ;;  %v95_v37 = vsel %vm61_vm0, %v55_v32, 0.0  ;;  %v56_v41 = vmul.f32 %v1626_v1, %v33_v36  ;;  %s1638_s21 = scalar_lea.vmem %s1619_s20, 16  ;;  %s1642_s22 = scalar_lea.vmem %s1619_s20, 32 }
   0xc   :  { %v92_v40 = vsel %vm61_vm0, %v54_v34, 0.0  ;;  %v59_v43 = vmul.f32 %v1626_v1, %v36_v39  ;;  %v101_v44 = vsel %vm61_vm0, %v57_v38, 0.0  ;;  %v58_v46 = vmul.f32 %v1626_v1, %v35_v42  ;;  %p1639_p0 = scmp.ne.s32.totalorder %s1619_s20, %s1638_s21  ;;  %p1643_p1 = scmp.lt.s32.totalorder %s1619_s20, %s1619_s20 }
   0xd   :  { %v98_v45 = vsel %vm61_vm0, %v56_v41, 0.0  ;;  %v1754_v53 = vshrl.u32 %v126_v50, 7  ;;  %v644_v54 = vunpack.c.0.s8 %v643_v52  ;;  %vm1481_vm1 = vcmask 130112   ;;  %p1644_p2 = scmp.lt.s32.totalorder %s1642_s22, %s1638_s21 }
   0xe   :  { %78 = vadd.xlane.f32.xlu1 %v77_v19  ;;  %75 = vadd.xlane.f32.xlu0 %v74_v21  ;;  %v107_v48 = vsel %vm61_vm0, %v59_v43, 0.0  ;;  %v104_v49 = vsel %vm61_vm0, %v58_v46, 0.0  ;;  %vm1488_vm2 = vcmask 195712   ;;  %vm1495_vm3 = vcmask 261312  }
   0xf   :  { %v1757_v55 = vsub.s32 0, %v1754_v53  ;;  %v1760_v56 = vsub.s32 1, %v1754_v53  ;;  %v1763_v57 = vsub.s32 2, %v1754_v53  ;;  %v1766_v58 = vsub.s32 3, %v1754_v53  ;;  %p1645_p3 = por %p1644_p2, %p1643_p1 }
  0x10   :  { %v1769_v59 = vsub.s32 4, %v1754_v53  ;;  %v1772_v60 = vsub.s32 5, %v1754_v53  ;;  %v1775_v61 = vsub.s32 6, %v1754_v53  ;;  %v1778_v62 = vsub.s32 7, %v1754_v53 }
  0x11   :  { %v1781_v1 = vsub.s32 %v644_v54, %v1754_v53  ;;  %vm1502_vm4 = vcmask 326912   ;;  %vm1509_vm5 = vcmask 392512   ;;  %vm1516_vm6 = vcmask 458112   ;;  %p1646_p4 = pnand %p1645_p3, %p1639_p0 }
  0x12   :  { %84 = vadd.xlane.f32.xlu1 %v83_v25  ;;  %81 = vadd.xlane.f32.xlu0 %v80_v27  ;;  %vm1523_vm7 = vcmask 523712   ;;  %vm1530_vm8 = vcmask 589312   ;;  %vm1537_vm9 = vcmask 654912   ;;  %vm1544_vm10 = vcmask 720512  }
  0x13   :  { %vm1551_vm11 = vcmask 786112   ;;  %vm1558_vm12 = vcmask 851712   ;;  %vm1565_vm13 = vcmask 917312   ;;  %vm1572_vm14 = vcmask 982912  }
  0x14   :  { %vm1579_vm15 = vcmask 1048512  }
  0x16   :  { %90 = vadd.xlane.f32.xlu1 %v89_v31  ;;  %87 = vadd.xlane.f32.xlu0 %v86_v33 }
  0x1a   :  { %96 = vadd.xlane.f32.xlu1 %v95_v37  ;;  %93 = vadd.xlane.f32.xlu0 %v92_v40 }
  0x1e   :  { %102 = vadd.xlane.f32.xlu1 %v101_v44  ;;  %99 = vadd.xlane.f32.xlu0 %v98_v45 }
  0x22   :  { %108 = vadd.xlane.f32.xlu1 %v107_v48  ;;  %105 = vadd.xlane.f32.xlu0 %v104_v49 }
  0x93   :  { %v64_v63 = vpop.xlane.xlu0 %63  ;;  %v70_v0 = vpop.xlane.xlu1 %69 }
  0x94   :  { %v129_v2 = vrot.slane %v64_v63, %v1757_v55  ;;  %v133_v3 = vrot.slane %v64_v63, %v1760_v56  ;;  %v137_v4 = vrot.slane %v64_v63, %v1763_v57  ;;  %v141_v5 = vrot.slane %v64_v63, %v1766_v58 }
  0x95   :  { %v145_v6 = vrot.slane %v64_v63, %v1769_v59  ;;  %v149_v7 = vrot.slane %v64_v63, %v1772_v60  ;;  %v153_v8 = vrot.slane %v64_v63, %v1775_v61  ;;  %v157_v9 = vrot.slane %v64_v63, %v1778_v62 }
  0x96   :  { %v638_v10 = vcombine.low %v129_v2, %v133_v3  ;;  %v639_v11 = vcombine.low %v137_v4, %v141_v5  ;;  %v193_v12 = vrot.slane %v70_v0, %v1757_v55  ;;  %v197_v13 = vrot.slane %v70_v0, %v1760_v56 }
  0x97   :  { %v67_v14 = vpop.xlane.xlu0 %66  ;;  %v1793_v15 = vpop.xlane.xlu1 %72  ;;  %v640_v16 = vcombine.low %v145_v6, %v149_v7  ;;  %v641_v17 = vcombine.low %v153_v8, %v157_v9  ;;  %v201_v18 = vrot.slane %v70_v0, %v1763_v57  ;;  %v205_v19 = vrot.slane %v70_v0, %v1766_v58 }
  0x98   :  { %v648_v20 = vrot.slane %v638_v10, %v1781_v1  ;;  %v655_v21 = vrot.slane %v639_v11, %v1781_v1  ;;  %v161_v22 = vrot.slane %v67_v14, %v1757_v55  ;;  %v165_v23 = vrot.slane %v67_v14, %v1760_v56 }
  0x99   :  { %v662_v24 = vrot.slane %v640_v16, %v1781_v1  ;;  %v669_v25 = vrot.slane %v641_v17, %v1781_v1  ;;  %v169_v26 = vrot.slane %v67_v14, %v1763_v57  ;;  %v173_v27 = vrot.slane %v67_v14, %v1766_v58 }
  0x9a   :  { %v670_v28 = vcombine.low %v648_v20, %v655_v21  ;;  %v177_v29 = vrot.slane %v67_v14, %v1769_v59  ;;  %v181_v30 = vrot.slane %v67_v14, %v1772_v60  ;;  %v185_v31 = vrot.slane %v67_v14, %v1775_v61 }
  0x9b   :  { %v1808_v32 = vpop.xlane.xlu1 %78  ;;  %v671_v33 = vcombine.low %v662_v24, %v669_v25  ;;  %v189_v34 = vrot.slane %v67_v14, %v1778_v62  ;;  %v687_v35 = vcombine.low %v161_v22, %v165_v23  ;;  %v688_v36 = vcombine.low %v169_v26, %v173_v27 }
  0x9c   :  { %v678_v37 = vrot.slane %v670_v28, %v1781_v1  ;;  %v689_v38 = vcombine.low %v177_v29, %v181_v30  ;;  %v209_v39 = vrot.slane %v70_v0, %v1769_v59  ;;  %v213_v40 = vrot.slane %v70_v0, %v1772_v60 }
  0x9d   :  { %v685_v41 = vrot.slane %v671_v33, %v1781_v1  ;;  %v690_v42 = vcombine.low %v185_v31, %v189_v34  ;;  %v697_v43 = vrot.slane %v687_v35, %v1781_v1  ;;  %v704_v44 = vrot.slane %v688_v36, %v1781_v1 }
  0x9e   :  { %v711_v45 = vrot.slane %v689_v38, %v1781_v1  ;;  %v217_v46 = vrot.slane %v70_v0, %v1775_v61  ;;  %v221_v47 = vrot.slane %v70_v0, %v1778_v62  ;;  %v736_v48 = vcombine.low %v193_v12, %v197_v13  ;;  %v76_v13 = vpop.xlane.xlu0 %75 }
  0x9f   :  { %v686_v49 = vcombine.low %v678_v37, %v685_v41  ;;  %v718_v51 = vrot.slane %v690_v42, %v1781_v1  ;;  %v719_v52 = vcombine.low %v697_v43, %v704_v44  ;;  %v737_v54 = vcombine.low %v201_v18, %v205_v19  ;;  %v1824_v5 = vpop.xlane.xlu1 %84 }
  0xa0   :  { %v738_v63 = vcombine.low %v209_v39, %v213_v40  ;;  %v739_v2 = vcombine.low %v217_v46, %v221_v47  ;;  %v746_v3 = vrot.slane %v736_v48, %v1781_v1  ;;  %v225_v4 = vrot.slane %v1793_v15, %v1757_v55 }
  0xa1   :  { %1423 = vperm.xlu0 %1632, %v686_v49   ;;  %v720_v6 = vcombine.low %v711_v45, %v718_v51  ;;  %v727_v7 = vrot.slane %v719_v52, %v1781_v1  ;;  %v753_v0 = vrot.slane %v737_v54, %v1781_v1  ;;  %v229_v8 = vrot.slane %v1793_v15, %v1760_v56 }
  0xa2   :  { %v760_v9 = vrot.slane %v738_v63, %v1781_v1  ;;  %v767_v10 = vrot.slane %v739_v2, %v1781_v1  ;;  %v233_v11 = vrot.slane %v1793_v15, %v1763_v57  ;;  %v237_v12 = vrot.slane %v1793_v15, %v1766_v58 }
  0xa3   :  { %v734_v14 = vrot.slane %v720_v6, %v1781_v1  ;;  %v768_v16 = vcombine.low %v746_v3, %v753_v0  ;;  %v241_v17 = vrot.slane %v1793_v15, %v1769_v59  ;;  %v245_v18 = vrot.slane %v1793_v15, %v1772_v60  ;;  %v91_v31 = vpop.xlane.xlu1 %90 }
  0xa4   :  { %v769_v19 = vcombine.low %v760_v9, %v767_v10  ;;  %v249_v20 = vrot.slane %v1793_v15, %v1775_v61  ;;  %v253_v21 = vrot.slane %v1793_v15, %v1778_v62  ;;  %v785_v22 = vcombine.low %v225_v4, %v229_v8 }
  0xa5   :  { %v735_v23 = vcombine.low %v727_v7, %v734_v14  ;;  %v776_v24 = vrot.slane %v768_v16, %v1781_v1  ;;  %v786_v25 = vcombine.low %v233_v11, %v237_v12  ;;  %v787_v26 = vcombine.low %v241_v17, %v245_v18 }
  0xa6   :  { %v783_v27 = vrot.slane %v769_v19, %v1781_v1  ;;  %v788_v28 = vcombine.low %v249_v20, %v253_v21  ;;  %v795_v29 = vrot.slane %v785_v22, %v1781_v1  ;;  %v257_v30 = vrot.slane %v76_v13, %v1757_v55 }
  0xa7   :  { %1426 = vperm.xlu1 %1633, %v735_v23   ;;  %v802_v33 = vrot.slane %v786_v25, %v1781_v1  ;;  %v809_v34 = vrot.slane %v787_v26, %v1781_v1  ;;  %v261_v15 = vrot.slane %v76_v13, %v1760_v56  ;;  %v265_v35 = vrot.slane %v76_v13, %v1763_v57  ;;  %v97_v25 = vpop.xlane.xlu1 %96 }
  0xa8   :  { %v784_v36 = vcombine.low %v776_v24, %v783_v27  ;;  %v816_v37 = vrot.slane %v788_v28, %v1781_v1  ;;  %v269_v38 = vrot.slane %v76_v13, %v1766_v58  ;;  %v273_v39 = vrot.slane %v76_v13, %v1769_v59 }
  0xa9   :  { %v817_v40 = vcombine.low %v795_v29, %v802_v33  ;;  %v277_v41 = vrot.slane %v76_v13, %v1772_v60  ;;  %v281_v42 = vrot.slane %v76_v13, %v1775_v61  ;;  %v285_v43 = vrot.slane %v76_v13, %v1778_v62 }
  0xaa   :  { %v818_v44 = vcombine.low %v809_v34, %v816_v37  ;;  %v834_v45 = vcombine.low %v257_v30, %v261_v15  ;;  %v835_v46 = vcombine.low %v265_v35, %v269_v38  ;;  %v417_v47 = vrot.slane %v91_v31, %v1757_v55 }
  0xab   :  { %1429 = vperm.xlu1 %1633, %v784_v36   ;;  %v825_v48 = vrot.slane %v817_v40, %v1781_v1  ;;  %v836_v49 = vcombine.low %v273_v39, %v277_v41  ;;  %v837_v51 = vcombine.low %v281_v42, %v285_v43  ;;  %v421_v52 = vrot.slane %v91_v31, %v1760_v56 }
  0xac   :  { %v832_v54 = vrot.slane %v818_v44, %v1781_v1  ;;  %v844_v63 = vrot.slane %v834_v45, %v1781_v1  ;;  %v851_v2 = vrot.slane %v835_v46, %v1781_v1  ;;  %v425_v3 = vrot.slane %v91_v31, %v1763_v57 }
  0xad   :  { %v858_v4 = vrot.slane %v836_v49, %v1781_v1  ;;  %v865_v6 = vrot.slane %v837_v51, %v1781_v1  ;;  %v429_v7 = vrot.slane %v91_v31, %v1766_v58  ;;  %v433_v0 = vrot.slane %v91_v31, %v1769_v59  ;;  %v82_v49 = vpop.xlane.xlu0 %81 }
  0xae   :  { %v833_v8 = vcombine.low %v825_v48, %v832_v54  ;;  %v866_v9 = vcombine.low %v844_v63, %v851_v2  ;;  %v437_v10 = vrot.slane %v91_v31, %v1772_v60  ;;  %v441_v11 = vrot.slane %v91_v31, %v1775_v61 }
  0xaf   :  { %v867_v12 = vcombine.low %v858_v4, %v865_v6  ;;  %v445_v13 = vrot.slane %v91_v31, %v1778_v62  ;;  %v1079_v14 = vcombine.low %v417_v47, %v421_v52  ;;  %v1080_v16 = vcombine.low %v425_v3, %v429_v7 }
  0xb0   :  { %1432 = vperm.xlu1 %1633, %v833_v8   ;;  %v874_v17 = vrot.slane %v866_v9, %v1781_v1  ;;  %v1081_v18 = vcombine.low %v433_v0, %v437_v10  ;;  %v289_v19 = vrot.slane %v1808_v32, %v1757_v55  ;;  %v293_v20 = vrot.slane %v1808_v32, %v1760_v56 }
  0xb1   :  { %v881_v21 = vrot.slane %v867_v12, %v1781_v1  ;;  %v1082_v22 = vcombine.low %v441_v11, %v445_v13  ;;  %v1089_v23 = vrot.slane %v1079_v14, %v1781_v1  ;;  %v1096_v24 = vrot.slane %v1080_v16, %v1781_v1 }
  0xb2   :  { %v1103_v26 = vrot.slane %v1081_v18, %v1781_v1  ;;  %v297_v27 = vrot.slane %v1808_v32, %v1763_v57  ;;  %v301_v28 = vrot.slane %v1808_v32, %v1766_v58  ;;  %v305_v29 = vrot.slane %v1808_v32, %v1769_v59 }
  0xb3   :  { %v882_v30 = vcombine.low %v874_v17, %v881_v21  ;;  %v1110_v31 = vrot.slane %v1082_v22, %v1781_v1  ;;  %v1111_v33 = vcombine.low %v1089_v23, %v1096_v24  ;;  %v309_v34 = vrot.slane %v1808_v32, %v1772_v60 }
  0xb4   :  { %v313_v15 = vrot.slane %v1808_v32, %v1775_v61  ;;  %v317_v35 = vrot.slane %v1808_v32, %v1778_v62  ;;  %v883_v36 = vcombine.low %v289_v19, %v293_v20  ;;  %v884_v37 = vcombine.low %v297_v27, %v301_v28  ;;  %v103_v19 = vpop.xlane.xlu1 %102 }
  0xb5   :  { %1435 = vperm.xlu1 %1633, %v882_v30   ;;  %v1112_v38 = vcombine.low %v1103_v26, %v1110_v31  ;;  %v1119_v39 = vrot.slane %v1111_v33, %v1781_v1  ;;  %v885_v40 = vcombine.low %v305_v29, %v309_v34  ;;  %v481_v41 = vrot.slane %v97_v25, %v1757_v55 }
  0xb6   :  { %v886_v42 = vcombine.low %v313_v15, %v317_v35  ;;  %v893_v43 = vrot.slane %v883_v36, %v1781_v1  ;;  %v900_v44 = vrot.slane %v884_v37, %v1781_v1  ;;  %v485_v45 = vrot.slane %v97_v25, %v1760_v56 }
  0xb7   :  { %v1126_v46 = vrot.slane %v1112_v38, %v1781_v1  ;;  %v907_v32 = vrot.slane %v885_v40, %v1781_v1  ;;  %v489_v47 = vrot.slane %v97_v25, %v1763_v57  ;;  %v493_v48 = vrot.slane %v97_v25, %v1766_v58 }
  0xb8   :  { %v914_v51 = vrot.slane %v886_v42, %v1781_v1  ;;  %v915_v52 = vcombine.low %v893_v43, %v900_v44  ;;  %v497_v54 = vrot.slane %v97_v25, %v1769_v59  ;;  %v501_v63 = vrot.slane %v97_v25, %v1772_v60 }
  0xb9   :  { %v1127_v2 = vcombine.low %v1119_v39, %v1126_v46  ;;  %v505_v3 = vrot.slane %v97_v25, %v1775_v61  ;;  %v509_v4 = vrot.slane %v97_v25, %v1778_v62  ;;  %v1177_v6 = vcombine.low %v481_v41, %v485_v45 }
  0xba   :  { %v916_v7 = vcombine.low %v907_v32, %v914_v51  ;;  %v923_v0 = vrot.slane %v915_v52, %v1781_v1  ;;  %v1178_v8 = vcombine.low %v489_v47, %v493_v48  ;;  %v1179_v9 = vcombine.low %v497_v54, %v501_v63 }
  0xbb   :  { %1450 = vperm.xlu0 %1632, %v1127_v2   ;;  %v1180_v10 = vcombine.low %v505_v3, %v509_v4  ;;  %v1187_v11 = vrot.slane %v1177_v6, %v1781_v1  ;;  %v321_v12 = vrot.slane %v82_v49, %v1757_v55  ;;  %v325_v13 = vrot.slane %v82_v49, %v1760_v56 }
  0xbc   :  { %v930_v14 = vrot.slane %v916_v7, %v1781_v1  ;;  %v1194_v16 = vrot.slane %v1178_v8, %v1781_v1  ;;  %v1201_v17 = vrot.slane %v1179_v9, %v1781_v1  ;;  %v329_v18 = vrot.slane %v82_v49, %v1763_v57 }
  0xbd   :  { %v1208_v20 = vrot.slane %v1180_v10, %v1781_v1  ;;  %v333_v21 = vrot.slane %v82_v49, %v1766_v58  ;;  %v337_v22 = vrot.slane %v82_v49, %v1769_v59  ;;  %v341_v23 = vrot.slane %v82_v49, %v1772_v60 }
  0xbe   :  { %v931_v24 = vcombine.low %v923_v0, %v930_v14  ;;  %v1209_v25 = vcombine.low %v1187_v11, %v1194_v16  ;;  %v345_v26 = vrot.slane %v82_v49, %v1775_v61  ;;  %v349_v27 = vrot.slane %v82_v49, %v1778_v62  ;;  %v109_v0 = vpop.xlane.xlu1 %108 }
  0xbf   :  { %v1210_v28 = vcombine.low %v1201_v17, %v1208_v20  ;;  %v932_v29 = vcombine.low %v321_v12, %v325_v13  ;;  %v933_v30 = vcombine.low %v329_v18, %v333_v21  ;;  %v934_v31 = vcombine.low %v337_v22, %v341_v23  ;;  %v88_v21 = vpop.xlane.xlu0 %87 }
  0xc0   :  { %1438 = vperm.xlu1 %1633, %v931_v24   ;;  %v1217_v33 = vrot.slane %v1209_v25, %v1781_v1  ;;  %v935_v34 = vcombine.low %v345_v26, %v349_v27  ;;  %v545_v15 = vrot.slane %v103_v19, %v1757_v55  ;;  %v549_v35 = vrot.slane %v103_v19, %v1760_v56 }
  0xc1   :  { %v1224_v36 = vrot.slane %v1210_v28, %v1781_v1  ;;  %v942_v37 = vrot.slane %v932_v29, %v1781_v1  ;;  %v949_v38 = vrot.slane %v933_v30, %v1781_v1  ;;  %v956_v39 = vrot.slane %v934_v31, %v1781_v1 }
  0xc2   :  { %v963_v40 = vrot.slane %v935_v34, %v1781_v1  ;;  %v553_v41 = vrot.slane %v103_v19, %v1763_v57  ;;  %v557_v42 = vrot.slane %v103_v19, %v1766_v58  ;;  %v561_v43 = vrot.slane %v103_v19, %v1769_v59 }
  0xc3   :  { %v1225_v44 = vcombine.low %v1217_v33, %v1224_v36  ;;  %v964_v45 = vcombine.low %v942_v37, %v949_v38  ;;  %v565_v46 = vrot.slane %v103_v19, %v1772_v60  ;;  %v569_v32 = vrot.slane %v103_v19, %v1775_v61 }
  0xc4   :  { %v965_v47 = vcombine.low %v956_v39, %v963_v40  ;;  %v573_v48 = vrot.slane %v103_v19, %v1778_v62  ;;  %v1275_v49 = vcombine.low %v545_v15, %v549_v35  ;;  %v1276_v51 = vcombine.low %v553_v41, %v557_v42 }
  0xc5   :  { %1456 = vperm.xlu0 %1632, %v1225_v44   ;;  %v972_v52 = vrot.slane %v964_v45, %v1781_v1  ;;  %v1277_v54 = vcombine.low %v561_v43, %v565_v46  ;;  %v353_v63 = vrot.slane %v1824_v5, %v1757_v55  ;;  %v357_v2 = vrot.slane %v1824_v5, %v1760_v56  ;;  %v94_v45 = vpop.xlane.xlu0 %93 }
  0xc6   :  { %v979_v3 = vrot.slane %v965_v47, %v1781_v1  ;;  %v1278_v4 = vcombine.low %v569_v32, %v573_v48  ;;  %v1285_v6 = vrot.slane %v1275_v49, %v1781_v1  ;;  %v1292_v7 = vrot.slane %v1276_v51, %v1781_v1 }
  0xc7   :  { %v1299_v8 = vrot.slane %v1277_v54, %v1781_v1  ;;  %v361_v9 = vrot.slane %v1824_v5, %v1763_v57  ;;  %v365_v10 = vrot.slane %v1824_v5, %v1766_v58  ;;  %v369_v11 = vrot.slane %v1824_v5, %v1769_v59 }
  0xc8   :  { %v980_v12 = vcombine.low %v972_v52, %v979_v3  ;;  %v1306_v13 = vrot.slane %v1278_v4, %v1781_v1  ;;  %v1307_v14 = vcombine.low %v1285_v6, %v1292_v7  ;;  %v373_v16 = vrot.slane %v1824_v5, %v1772_v60 }
  0xc9   :  { %v377_v17 = vrot.slane %v1824_v5, %v1775_v61  ;;  %v381_v18 = vrot.slane %v1824_v5, %v1778_v62  ;;  %v981_v19 = vcombine.low %v353_v63, %v357_v2  ;;  %v982_v20 = vcombine.low %v361_v9, %v365_v10 }
  0xca   :  { %1441 = vperm.xlu1 %1633, %v980_v12   ;;  %v1308_v22 = vcombine.low %v1299_v8, %v1306_v13  ;;  %v1315_v23 = vrot.slane %v1307_v14, %v1781_v1  ;;  %v983_v24 = vcombine.low %v369_v11, %v373_v16  ;;  %v609_v25 = vrot.slane %v109_v0, %v1757_v55 }
  0xcb   :  { %v984_v26 = vcombine.low %v377_v17, %v381_v18  ;;  %v991_v27 = vrot.slane %v981_v19, %v1781_v1  ;;  %v998_v28 = vrot.slane %v982_v20, %v1781_v1  ;;  %v613_v29 = vrot.slane %v109_v0, %v1760_v56  ;;  %v100_v18 = vpop.xlane.xlu0 %99 }
  0xcc   :  { %v1322_v30 = vrot.slane %v1308_v22, %v1781_v1  ;;  %v1005_v5 = vrot.slane %v983_v24, %v1781_v1  ;;  %v617_v31 = vrot.slane %v109_v0, %v1763_v57  ;;  %v621_v33 = vrot.slane %v109_v0, %v1766_v58 }
  0xcd   :  { %v1012_v34 = vrot.slane %v984_v26, %v1781_v1  ;;  %v1013_v15 = vcombine.low %v991_v27, %v998_v28  ;;  %v625_v35 = vrot.slane %v109_v0, %v1769_v59  ;;  %v629_v36 = vrot.slane %v109_v0, %v1772_v60 }
  0xce   :  { %v1323_v37 = vcombine.low %v1315_v23, %v1322_v30  ;;  %v633_v38 = vrot.slane %v109_v0, %v1775_v61  ;;  %v637_v39 = vrot.slane %v109_v0, %v1778_v62  ;;  %v1373_v40 = vcombine.low %v609_v25, %v613_v29 }
  0xcf   :  { %v1014_v41 = vcombine.low %v1005_v5, %v1012_v34  ;;  %v1021_v42 = vrot.slane %v1013_v15, %v1781_v1  ;;  %v1374_v43 = vcombine.low %v617_v31, %v621_v33  ;;  %v1375_v44 = vcombine.low %v625_v35, %v629_v36 }
  0xd0   :  { %1462 = vperm.xlu0 %1632, %v1323_v37   ;;  %v1376_v46 = vcombine.low %v633_v38, %v637_v39  ;;  %v1383_v32 = vrot.slane %v1373_v40, %v1781_v1  ;;  %v385_v47 = vrot.slane %v88_v21, %v1757_v55  ;;  %v389_v48 = vrot.slane %v88_v21, %v1760_v56 }
  0xd1   :  { %v1028_v49 = vrot.slane %v1014_v41, %v1781_v1  ;;  %v1390_v51 = vrot.slane %v1374_v43, %v1781_v1  ;;  %v1397_v52 = vrot.slane %v1375_v44, %v1781_v1  ;;  %v393_v54 = vrot.slane %v88_v21, %v1763_v57 }
  0xd2   :  { %v1404_v63 = vrot.slane %v1376_v46, %v1781_v1  ;;  %v397_v2 = vrot.slane %v88_v21, %v1766_v58  ;;  %v401_v3 = vrot.slane %v88_v21, %v1769_v59  ;;  %v405_v4 = vrot.slane %v88_v21, %v1772_v60 }
  0xd3   :  { %v1029_v6 = vcombine.low %v1021_v42, %v1028_v49  ;;  %v1405_v7 = vcombine.low %v1383_v32, %v1390_v51  ;;  %v409_v0 = vrot.slane %v88_v21, %v1775_v61  ;;  %v413_v8 = vrot.slane %v88_v21, %v1778_v62  ;;  %v106_v42 = vpop.xlane.xlu0 %105 }
  0xd4   :  { %v1406_v9 = vcombine.low %v1397_v52, %v1404_v63  ;;  %v1030_v10 = vcombine.low %v385_v47, %v389_v48  ;;  %v1031_v11 = vcombine.low %v393_v54, %v397_v2  ;;  %v1032_v12 = vcombine.low %v401_v3, %v405_v4 }
  0xd5   :  { %1444 = vperm.xlu1 %1633, %v1029_v6   ;;  %v1413_v13 = vrot.slane %v1405_v7, %v1781_v1  ;;  %v1033_v14 = vcombine.low %v409_v0, %v413_v8  ;;  %v449_v16 = vrot.slane %v94_v45, %v1757_v55  ;;  %v453_v17 = vrot.slane %v94_v45, %v1760_v56 }
  0xd6   :  { %v1420_v19 = vrot.slane %v1406_v9, %v1781_v1  ;;  %v1040_v20 = vrot.slane %v1030_v10, %v1781_v1  ;;  %v1047_v22 = vrot.slane %v1031_v11, %v1781_v1  ;;  %v1054_v21 = vrot.slane %v1032_v12, %v1781_v1 }
  0xd7   :  { %v1061_v23 = vrot.slane %v1033_v14, %v1781_v1  ;;  %v457_v24 = vrot.slane %v94_v45, %v1763_v57  ;;  %v461_v25 = vrot.slane %v94_v45, %v1766_v58  ;;  %v465_v26 = vrot.slane %v94_v45, %v1769_v59 }
  0xd8   :  { %v1421_v27 = vcombine.low %v1413_v13, %v1420_v19  ;;  %v1062_v28 = vcombine.low %v1040_v20, %v1047_v22  ;;  %v469_v29 = vrot.slane %v94_v45, %v1772_v60  ;;  %v473_v30 = vrot.slane %v94_v45, %v1775_v61 }
  0xd9   :  { %v1063_v5 = vcombine.low %v1054_v21, %v1061_v23  ;;  %v477_v31 = vrot.slane %v94_v45, %v1778_v62  ;;  %v1128_v33 = vcombine.low %v449_v16, %v453_v17  ;;  %v1129_v34 = vcombine.low %v457_v24, %v461_v25 }
  0xda   :  { %1468 = vperm.xlu0 %1632, %v1421_v27   ;;  %v1070_v15 = vrot.slane %v1062_v28, %v1781_v1  ;;  %v1130_v35 = vcombine.low %v465_v26, %v469_v29  ;;  %v513_v36 = vrot.slane %v100_v18, %v1757_v55  ;;  %v517_v37 = vrot.slane %v100_v18, %v1760_v56 }
  0xdb   :  { %v1077_v38 = vrot.slane %v1063_v5, %v1781_v1  ;;  %v1131_v39 = vcombine.low %v473_v30, %v477_v31  ;;  %v1138_v40 = vrot.slane %v1128_v33, %v1781_v1  ;;  %v1145_v41 = vrot.slane %v1129_v34, %v1781_v1 }
  0xdc   :  { %v1152_v43 = vrot.slane %v1130_v35, %v1781_v1  ;;  %v521_v44 = vrot.slane %v100_v18, %v1763_v57  ;;  %v525_v45 = vrot.slane %v100_v18, %v1766_v58  ;;  %v529_v46 = vrot.slane %v100_v18, %v1769_v59 }
  0xdd   :  { %v1078_v32 = vcombine.low %v1070_v15, %v1077_v38  ;;  %v1159_v47 = vrot.slane %v1131_v39, %v1781_v1  ;;  %v1160_v48 = vcombine.low %v1138_v40, %v1145_v41  ;;  %v533_v49 = vrot.slane %v100_v18, %v1772_v60 }
  0xde   :  { %v537_v51 = vrot.slane %v100_v18, %v1775_v61  ;;  %v541_v52 = vrot.slane %v100_v18, %v1778_v62  ;;  %v1226_v54 = vcombine.low %v513_v36, %v517_v37  ;;  %v1227_v63 = vcombine.low %v521_v44, %v525_v45 }
  0xdf   :  { %1447 = vperm.xlu1 %1633, %v1078_v32   ;;  %v1161_v2 = vcombine.low %v1152_v43, %v1159_v47  ;;  %v1168_v3 = vrot.slane %v1160_v48, %v1781_v1  ;;  %v1228_v4 = vcombine.low %v529_v46, %v533_v49  ;;  %v577_v6 = vrot.slane %v106_v42, %v1757_v55 }
  0xe0   :  { %v1229_v7 = vcombine.low %v537_v51, %v541_v52  ;;  %v1236_v0 = vrot.slane %v1226_v54, %v1781_v1  ;;  %v1243_v8 = vrot.slane %v1227_v63, %v1781_v1  ;;  %v581_v9 = vrot.slane %v106_v42, %v1760_v56 }
  0xe1   :  { %v1175_v10 = vrot.slane %v1161_v2, %v1781_v1  ;;  %v1250_v11 = vrot.slane %v1228_v4, %v1781_v1  ;;  %v585_v12 = vrot.slane %v106_v42, %v1763_v57  ;;  %v589_v13 = vrot.slane %v106_v42, %v1766_v58 }
  0xe2   :  { %v1257_v14 = vrot.slane %v1229_v7, %v1781_v1  ;;  %v1258_v16 = vcombine.low %v1236_v0, %v1243_v8  ;;  %v593_v55 = vrot.slane %v106_v42, %v1769_v59  ;;  %v597_v17 = vrot.slane %v106_v42, %v1772_v60 }
  0xe3   :  { %v1176_v18 = vcombine.low %v1168_v3, %v1175_v10  ;;  %v601_v19 = vrot.slane %v106_v42, %v1775_v61  ;;  %v605_v56 = vrot.slane %v106_v42, %v1778_v62  ;;  %v1324_v20 = vcombine.low %v577_v6, %v581_v9 }
  0xe4   :  { %v1259_v22 = vcombine.low %v1250_v11, %v1257_v14  ;;  %v1266_v21 = vrot.slane %v1258_v16, %v1781_v1  ;;  %v1325_v23 = vcombine.low %v585_v12, %v589_v13  ;;  %v1326_v57 = vcombine.low %v593_v55, %v597_v17 }
  0xe5   :  { %1453 = vperm.xlu1 %1633, %v1176_v18   ;;  %v1327_v58 = vcombine.low %v601_v19, %v605_v56  ;;  %v1334_v24 = vrot.slane %v1324_v20, %v1781_v1  ;;  %v1664_v5 = vmov 0.0   ;;  %v2038_v36 = vand.u32 127, %v126_v50 }
  0xe6   :  { %v1273_v25 = vrot.slane %v1259_v22, %v1781_v1  ;;  %v1341_v59 = vrot.slane %v1325_v23, %v1781_v1  ;;  %v1348_v60 = vrot.slane %v1326_v57, %v1781_v1  ;;  %20 = vst [vmem:[#allocation2] sm:$0x1] %v1664_v5 }
  0xe7   :  { %v1355_v61 = vrot.slane %v1327_v58, %v1781_v1  ;;  %v1476_v37 = vadd.s32 4294967288, %v2038_v36  ;;  %v1483_v39 = vadd.s32 4294967280, %v2038_v36  ;;  %v1490_v40 = vadd.s32 4294967272, %v2038_v36 }
  0xe8   :  { %v1274_v26 = vcombine.low %v1266_v21, %v1273_v25  ;;  %v1356_v62 = vcombine.low %v1334_v24, %v1341_v59  ;;  %v1497_v41 = vadd.s32 4294967264, %v2038_v36  ;;  %v1504_v43 = vadd.s32 4294967256, %v2038_v36 }
  0xe9   :  { %v1357_v27 = vcombine.low %v1348_v60, %v1355_v61  ;;  %v1479_v42 = vsub.s32 %v1476_v37, %v1754_v53  ;;  %v1486_v45 = vsub.s32 %v1483_v39, %v1754_v53  ;;  %v1511_v46 = vadd.s32 4294967248, %v2038_v36 }
  0xea   :  { %1459 = vperm.xlu1 %1633, %v1274_v26   ;;  %v1364_v28 = vrot.slane %v1356_v62, %v1781_v1  ;;  %v1474_v50 = vsub.s32 %v2038_v36, %v1754_v53  ;;  %v1493_v32 = vsub.s32 %v1490_v40, %v1754_v53  ;;  %v1518_v47 = vadd.s32 4294967240, %v2038_v36 }
  0xeb   :  { %v1371_v29 = vrot.slane %v1357_v27, %v1781_v1  ;;  %v1500_v49 = vsub.s32 %v1497_v41, %v1754_v53  ;;  %v1525_v51 = vadd.s32 4294967232, %v2038_v36  ;;  %v1507_v54 = vsub.s32 %v1504_v43, %v1754_v53 }
  0xec   :  { %v1514_v3 = vsub.s32 %v1511_v46, %v1754_v53  ;;  %v1521_v7 = vsub.s32 %v1518_v47, %v1754_v53  ;;  %v1539_v9 = vadd.s32 4294967216, %v2038_v36  ;;  %v1532_v11 = vadd.s32 4294967224, %v2038_v36 }
  0xed   :  { %v1372_v30 = vcombine.low %v1364_v28, %v1371_v29  ;;  %v1528_v8 = vsub.s32 %v1525_v51, %v1754_v53  ;;  %v1546_v17 = vadd.s32 4294967208, %v2038_v36  ;;  %v1553_v57 = vadd.s32 4294967200, %v2038_v36  ;;  %v60_v47 = vld [vmem:[#allocation2] sm:$0x1] }
  0xee   :  { %v1542_v22 = vsub.s32 %v1539_v9, %v1754_v53  ;;  %v1535_v21 = vsub.s32 %v1532_v11, %v1754_v53  ;;  %v1560_v59 = vadd.s32 4294967192, %v2038_v36  ;;  %v1567_v29 = vadd.s32 4294967184, %v2038_v36 }
  0xef   :  { %1465 = vperm.xlu1 %1633, %v1372_v30   ;;  %v1549_v62 = vsub.s32 %v1546_v17, %v1754_v53  ;;  %v1556_v27 = vsub.s32 %v1553_v57, %v1754_v53  ;;  %v1574_v30 = vadd.s32 4294967176, %v2038_v36 }
  0xf0   :  { %v1570_v37 = vsub.s32 %v1567_v29, %v1754_v53 }
 0x120   :  { %v1424_v44 = vpop.permute.xlu0 %1423 }
 0x121   :  { %v1475_v4 = vrot.slane %v1424_v44, %v1474_v50 }
 0x126   :  { %v1427_v31 = vpop.permute.xlu1 %1426 }
 0x127   :  { %v1480_v52 = vrot.slane %v1427_v31, %v1479_v42 }
 0x129   :  { %v1482_v10 = vsel %vm1481_vm1, %v1480_v52, %v1475_v4 }
 0x12a   :  { %v1430_v33 = vpop.permute.xlu1 %1429 }
 0x12b   :  { %v1487_v63 = vrot.slane %v1430_v33, %v1486_v45 }
 0x12d   :  { %v1489_v14 = vsel %vm1488_vm2, %v1487_v63, %v1482_v10 }
 0x12f   :  { %v1433_v34 = vpop.permute.xlu1 %1432 }
 0x130   :  { %v1494_v6 = vrot.slane %v1433_v34, %v1493_v32 }
 0x132   :  { %v1496_v55 = vsel %vm1495_vm3, %v1494_v6, %v1489_v14 }
 0x134   :  { %v1436_v15 = vpop.permute.xlu1 %1435 }
 0x135   :  { %v1501_v0 = vrot.slane %v1436_v15, %v1500_v49  ;;  %v1563_v15 = vsub.s32 %v1560_v59, %v1754_v53 }
 0x137   :  { %v1503_v19 = vsel %vm1502_vm4, %v1501_v0, %v1496_v55 }
 0x13a   :  { %v1451_v2 = vpop.permute.xlu0 %1450 }
 0x13b   :  { %v1536_v26 = vrot.slane %v1451_v2, %v1535_v21 }
 0x13f   :  { %v1439_v35 = vpop.permute.xlu1 %1438 }
 0x140   :  { %v1508_v12 = vrot.slane %v1439_v35, %v1507_v54 }
 0x142   :  { %v1510_v23 = vsel %vm1509_vm5, %v1508_v12, %v1503_v19 }
 0x144   :  { %v1457_v56 = vpop.permute.xlu0 %1456 }
 0x145   :  { %v1550_v34 = vrot.slane %v1457_v56, %v1549_v62 }
 0x149   :  { %v1442_v38 = vpop.permute.xlu1 %1441 }
 0x14a   :  { %v1515_v16 = vrot.slane %v1442_v38, %v1514_v3  ;;  %v1577_v38 = vsub.s32 %v1574_v30, %v1754_v53  ;;  %v1603_v53 = vstv %s2091_s2 }
 0x14c   :  { %v1517_v58 = vsel %vm1516_vm6, %v1515_v16, %v1510_v23 }
 0x14f   :  { %v1463_v28 = vpop.permute.xlu0 %1462 }
 0x150   :  { %v1564_v42 = vrot.slane %v1463_v28, %v1563_v15 }
 0x154   :  { %v1445_v48 = vpop.permute.xlu1 %1444 }
 0x155   :  { %v1522_v18 = vrot.slane %v1445_v48, %v1521_v7 }
 0x157   :  { %v1524_v24 = vsel %vm1523_vm7, %v1522_v18, %v1517_v58 }
 0x159   :  { %v1469_v40 = vpop.permute.xlu0 %1468 }
 0x15a   :  { %v1578_v44 = vrot.slane %v1469_v40, %v1577_v38 }
 0x15e   :  { %v1448_v13 = vpop.permute.xlu1 %1447 }
 0x15f   :  { %v1529_v20 = vrot.slane %v1448_v13, %v1528_v8 }
 0x161   :  { %v1531_v60 = vsel %vm1530_vm8, %v1529_v20, %v1524_v24 }
 0x162   :  { %v1538_v5 = vsel %vm1537_vm9, %v1536_v26, %v1531_v60 }
 0x164   :  { %v1454_v25 = vpop.permute.xlu1 %1453 }
 0x165   :  { %v1543_v61 = vrot.slane %v1454_v25, %v1542_v22 }
 0x167   :  { %v1545_v31 = vsel %vm1544_vm10, %v1543_v61, %v1538_v5 }
 0x168   :  { %v1552_v39 = vsel %vm1551_vm11, %v1550_v34, %v1545_v31 }
 0x169   :  { %v1460_v33 = vpop.permute.xlu1 %1459 }
 0x16a   :  { %v1557_v35 = vrot.slane %v1460_v33, %v1556_v27 }
 0x16c   :  { %v1559_v41 = vsel %vm1558_vm12, %v1557_v35, %v1552_v39 }
 0x16d   :  { %v1566_v45 = vsel %vm1565_vm13, %v1564_v42, %v1559_v41 }
 0x16e   :  { %v1466_v36 = vpop.permute.xlu1 %1465 }
 0x16f   :  { %v1571_v43 = vrot.slane %v1466_v36, %v1570_v37 }
 0x171   :  { %v1573_v46 = vsel %vm1572_vm14, %v1571_v43, %v1566_v45 }
 0x172   :  { %v1580_v50 = vsel %vm1579_vm15, %v1578_v44, %v1573_v46 }
 0x173   :  { %v1587_v32 = vrot.slane %v1580_v50, %v1781_v1 }
 0x175   :  { %v1594_v48 = vrot.slane %v1587_v32, %v1781_v1 }
 0x177   :  { %v1596_v49 = vadd.f32 %v1594_v48, %v60_v47 }
 0x179   :  { %1597 = vst [vmem:[#allocation2] sm:$0x1] %v1596_v49 }
 0x180   :  { %v1601_v51 = vld [vmem:[#allocation2] sm:$0x1] }
 0x181   :  { %v1604_v52 = vadd.f32 %v1603_v53, %v1601_v51 }
 0x183   :  { %v1627_v54 = vmul.f32 -1.442695, %v1604_v52 }
 0x185   :  { %1634 = vpow2.f32 %v1627_v54 }
 0x18f   :  { %v1635_v63 = vpop.eup %1634 }
 0x190   :  { %v1608_v2 = vadd.f32 1.0, %v1635_v63 }
 0x192   :  { %1636 = vrcp.f32 %v1608_v2 }
 0x19c   :  { %v1637_v3 = vpop.eup %1636 }
 0x19d   :  { %1611 = vst [vmem:[#allocation4] sm:$0x1] %v1637_v3 }
 0x19e   :  { %1649 = shalt.err (!%p1646_p4)
}
 0x19f   :  { %s1650_s1 = scalar_lea.hbm %s2092_s3, 16 }
 0x1a0   :  { %p1651_p5 = scmp.ne.s32.totalorder %s2092_s3, %s1650_s1  ;;  %p1654_p6 = scmp.lt.u32.totalorder %s1650_s1, %s2092_s3 }
 0x1a2   :  { %p1656_p7 = pnand %p1654_p6, %p1651_p5 }
 0x1a4   :  { %1659 = shalt.err (!%p1656_p7)
}
 0x1a5   :  { %1621 = dma.vmem_to_hbm [thread:$0]  %s1619_s20, 16, %s2092_s3, [#allocation5]  }
 0x1a6   :  { %1660 = dma.done.wait [#allocation5], 16  }
 0x1a7   :  { %1661 = vsyncadd [#allocation5], 4294967280 }
 0x1a8   :  { %1625 = vsyncpa [#allocation5], 1 }

</bundles_post_ra>
